<compile_context>
chip_gen: v5e
topology: v5e:2x2
jax: 0.10.0
libtpu: 0.0.40
codegen_flags: <defaults>
</compile_context>

<pallas_src>
import functools

import jax
import jax.numpy as jnp
from jax.experimental import pallas as pl
from jax.experimental.pallas import tpu as pltpu

EPS = 1e-5


def _round_up(x, m):
    return ((x + m - 1) // m) * m


def _default_vmem_limit():
    """Generation-aware scoped-VMEM limit (128 MiB phys on v5e/v6e, 64 MiB on v7x)."""
    try:
        cap = int(pltpu.get_tpu_info().vmem_capacity_bytes)
    except Exception:
        cap = 64 * 1024 * 1024           # conservative (v7x-sized) fallback
    return int(max(32 << 20, min(cap * 3 // 4, 112 << 20)))


_VMEM_LIMIT = _default_vmem_limit()


# --------------------- phase 1: conv + masked channel stats ---------------------
def _conv_stats_kernel(x_ref, w_ref, sum_ref, sumsq_ref, *, p_total, tile_rows):
    # x_ref: [tp, ckk]   w_ref: [ckk, C]   sum/sumsq_ref: [1, 1, C] resident acc.
    conv = jnp.dot(x_ref[...], w_ref[...], preferred_element_type=jnp.float32)

    # P is NOT padded in HBM: rows past the true P in the (cdiv) last tile hold
    # stale VMEM data, and an uneven megacore split re-reads a clamped tile.
    # Mask those rows out of the batch statistics (exact true-P divisor later).
    c = pl.program_id(0)
    i = pl.program_id(1)
    row0 = (c * pl.num_programs(1) + i) * tile_rows
    rows = row0 + jax.lax.broadcasted_iota(jnp.int32, conv.shape, 0)
    conv = jnp.where(rows < p_total, conv, 0.0)

    @pl.when(i == 0)
    def _():
        sum_ref[...] = jnp.zeros_like(sum_ref)
        sumsq_ref[...] = jnp.zeros_like(sumsq_ref)

    sum_ref[...] += jnp.sum(conv, axis=0, keepdims=True)[None]
    sumsq_ref[...] += jnp.sum(conv * conv, axis=0, keepdims=True)[None]


# ------------------- phase 2: conv + BN-FMA + ReLU epilogue ---------------------
def _conv_bn_relu_kernel(x_ref, w_ref, scale_ref, shift_ref, o_ref):
    conv = jnp.dot(x_ref[...], w_ref[...], preferred_element_type=jnp.float32)
    y = conv * scale_ref[...] + shift_ref[...]          # single per-channel FMA
    o_ref[...] = jnp.maximum(y, 0.0).astype(o_ref.dtype)


# ------------------------------ glue / wrappers ---------------------------------
def _im2col(x_nhwc, kh, kw):
    # Only used for spatial kernels (k > 1); IDAM itself is all 1x1.
    n, h, w, cin = x_nhwc.shape
    oh, ow = h - kh + 1, w - kw + 1
    cols = []
    for i in range(kh):
        for j in range(kw):
            cols.append(x_nhwc[:, i:i + oh, j:j + ow, :])
    patches = jnp.stack(cols, axis=3)                    # [N,OH,OW,KH*KW,Cin]
    return patches.reshape(n * oh * ow, kh * kw * cin)   # [P, CKK] (un-padded)


@functools.partial(jax.jit, static_argnames=("tp", "matmul_dtype", "out_dtype"))
def conv2d_bn_relu_nhwc(x_nhwc, weight_oihw, gamma, beta, *,
                        tp=None, matmul_dtype=jnp.bfloat16,
                        out_dtype=jnp.float32):
    """x_nhwc: [N,H,W,Cin]; weight_oihw: [Cout,Cin,KH,KW] -> [N,OH,OW,Cout]."""
    n, h, w, cin = x_nhwc.shape
    cout, cin_w, kh, kw = weight_oihw.shape
    assert cin_w == cin
    oh, ow = h - kh + 1, w - kw + 1
    p = n * oh * ow
    ckk = kh * kw * cin

    # ---- matmul operands: no lane padding of ckk, no P padding in HBM ----
    if kh == 1 and kw == 1:
        # IDAM's convs are all 1x1: "im2col" is a free reshape of the NHWC input.
        x2d = x_nhwc.reshape(p, cin).astype(matmul_dtype)
    else:
        # TODO(synk): fold the kh*kw shifted-window reduction into the kernel to
        # avoid materializing the KH*KW-inflated patch matrix in HBM for k > 1.
        x2d = _im2col(x_nhwc, kh, kw).astype(matmul_dtype)
    w_mat = jnp.transpose(weight_oihw, (2, 3, 1, 0)).reshape(ckk, cout)
    w_mat = w_mat.astype(matmul_dtype)

    # ---- VMEM-budget-derived P tile (16-row multiple for bf16 sublane packing) ----
    in_item = jnp.dtype(matmul_dtype).itemsize
    out_item = jnp.dtype(out_dtype).itemsize
    w_bytes = ckk * cout * in_item                       # single-buffered weight
    per_row = 2 * ckk * in_item + 2 * cout * out_item    # dbl-buffered x / out
    avail = max(_VMEM_LIMIT - w_bytes - (4 << 20), 16 * per_row)
    tp_req = 2048 if tp is None else tp
    tile_rows = min(tp_req, avail // per_row, _round_up(p, 16))
    tile_rows = max(16, (tile_rows // 16) * 16)

    n_tiles = -(-p // tile_rows)
    split = 2 if n_tiles >= 4 else 1                     # megacore split (v7x)
    tiles_per_core = -(-n_tiles // split)

    flops = 2 * p * ckk * cout
    in_bytes = p * ckk * in_item + w_bytes

    # ---------- phase 1: per-channel sum / sum-of-squares (masked tail) ----------
    def x_map1(c, i):
        # Clamp so the trailing (duplicate) tile of an uneven split never reads
        # past the array; its rows are masked out of the stats in the kernel.
        return (jnp.minimum(c * tiles_per_core + i, n_tiles - 1), 0)

    csum, csumsq = pl.pallas_call(
        functools.partial(_conv_stats_kernel, p_total=p, tile_rows=tile_rows),
        out_shape=(jax.ShapeDtypeStruct((split, 1, cout), jnp.float32),
                   jax.ShapeDtypeStruct((split, 1, cout), jnp.float32)),
        grid_spec=pltpu.PrefetchScalarGridSpec(
            num_scalar_prefetch=0,
            grid=(split, tiles_per_core),
            in_specs=[
                pl.BlockSpec((tile_rows, ckk), x_map1),
                pl.BlockSpec((ckk, cout), lambda c, i: (0, 0),
                             pipeline_mode=pl.Buffered(1)),
            ],
            out_specs=[
                pl.BlockSpec((1, 1, cout), lambda c, i: (c, 0, 0)),
                pl.BlockSpec((1, 1, cout), lambda c, i: (c, 0, 0)),
            ]),
        compiler_params=pltpu.CompilerParams(
            dimension_semantics=("parallel", "arbitrary"),
            vmem_limit_bytes=_VMEM_LIMIT),
        cost_estimate=pl.CostEstimate(flops=flops, transcendentals=0,
                                      bytes_accessed=in_bytes + 2 * split * cout * 4),
    )(x2d, w_mat)

    # ---- tiny per-channel BN coefficients in plain JAX (exact true-P divisor) ----
    # TODO(synk): E[x^2]-E[x]^2 in fp32 can cancel when |mean| >> std per channel;
    # switch to a centered second pass if exact BN-stat parity is required.
    csum = jnp.sum(csum, axis=0)                         # [1, Cout]
    csumsq = jnp.sum(csumsq, axis=0)                     # [1, Cout]
    mean = csum / p
    var = jnp.maximum(csumsq / p - mean * mean, 0.0)     # biased (training BN)
    g = gamma.astype(jnp.float32).reshape(1, cout)
    b = beta.astype(jnp.float32).reshape(1, cout)
    scale = g * jax.lax.rsqrt(var + EPS)                 # [1, Cout]
    shift = b - mean * scale                             # [1, Cout]

    # -------- phase 2: recompute conv tile + FMA epilogue + ReLU (parallel) --------
    inv_spec = functools.partial(pl.BlockSpec, pipeline_mode=pl.Buffered(1))
    out2d = pl.pallas_call(
        _conv_bn_relu_kernel,
        out_shape=jax.ShapeDtypeStruct((p, cout), out_dtype),
        grid_spec=pltpu.PrefetchScalarGridSpec(
            num_scalar_prefetch=0,
            grid=(n_tiles,),
            in_specs=[
                pl.BlockSpec((tile_rows, ckk), lambda i: (i, 0)),
                inv_spec((ckk, cout), lambda i: (0, 0)),
                inv_spec((1, cout), lambda i: (0, 0)),
                inv_spec((1, cout), lambda i: (0, 0)),
            ],
            out_specs=pl.BlockSpec((tile_rows, cout), lambda i: (i, 0))),
        compiler_params=pltpu.CompilerParams(
            dimension_semantics=("parallel",),
            vmem_limit_bytes=_VMEM_LIMIT),
        cost_estimate=pl.CostEstimate(flops=flops, transcendentals=0,
                                      bytes_accessed=in_bytes + p * cout * out_item),
    )(x2d, w_mat, scale, shift)

    return out2d.reshape(n, oh, ow, cout)


def conv2d_bn_relu(x_nchw, weight_oihw, gamma, beta, **kw):
    """NCHW wrapper (PyTorch parity).  Prefer conv2d_bn_relu_nhwc in layer chains
    to avoid two full-tensor layout transposes per layer."""
    x_nhwc = jnp.transpose(x_nchw, (0, 2, 3, 1))
    out = conv2d_bn_relu_nhwc(x_nhwc, weight_oihw, gamma, beta, **kw)
    return jnp.transpose(out, (0, 3, 1, 2))


# ------------------------------ pure-JAX reference ------------------------------
def _reference_nchw(x_nchw, weight_oihw, gamma, beta, matmul_dtype=jnp.float32):
    conv = jax.lax.conv_general_dilated(
        x_nchw.astype(matmul_dtype), weight_oihw.astype(matmul_dtype),
        window_strides=(1, 1), padding="VALID",
        dimension_numbers=("NCHW", "OIHW", "NCHW"),
        preferred_element_type=jnp.float32)
    mean = jnp.mean(conv, axis=(0, 2, 3), keepdims=True)
    var = jnp.mean((conv - mean) ** 2, axis=(0, 2, 3), keepdims=True)
    y = (conv - mean) * jax.lax.rsqrt(var + EPS)
    y = y * gamma.reshape(1, -1, 1, 1) + beta.reshape(1, -1, 1, 1)
    return jnp.maximum(y, 0.0)


if __name__ == "__main__":
    key = jax.random.PRNGKey(0)
    k1, k2, k3, k4, k5, k6 = jax.random.split(key, 6)

    # --- case 1: IDAM sim_mat_conv-style layer: 1x1 conv on a NxN "image" ---
    #     (emb_dims=16 -> in_channels = 2*16+4 = 36, num_points = 8)
    n, cin, hh, ww, cout, ks = 2, 36, 8, 8, 32, 1
    x = jax.random.normal(k1, (n, cin, hh, ww), dtype=jnp.float32)
    bound = 1.0 / ((cin * ks * ks) ** 0.5)
    wgt = jax.random.uniform(k2, (cout, cin, ks, ks),
                             minval=-bound, maxval=bound, dtype=jnp.float32)
    gamma = 1.0 + 0.2 * jax.random.normal(k3, (cout,), dtype=jnp.float32)
    beta = 0.1 * jax.random.normal(k4, (cout,), dtype=jnp.float32)

    out_bf = jax.block_until_ready(conv2d_bn_relu(x, wgt, gamma, beta))
    out_f32 = jax.block_until_ready(
        conv2d_bn_relu(x, wgt, gamma, beta, matmul_dtype=jnp.float32))
    ref_f32 = jax.block_until_ready(_reference_nchw(x, wgt, gamma, beta))
    ref_bf = jax.block_until_ready(
        _reference_nchw(x, wgt, gamma, beta, matmul_dtype=jnp.bfloat16))

    assert out_f32.shape == (n, cout, hh, ww)
    assert jnp.allclose(out_f32, ref_f32, atol=1e-4, rtol=1e-4)      # exact path
    assert jnp.allclose(out_bf, ref_bf, atol=5e-3, rtol=5e-3)        # bf16 MXU path
    assert jnp.allclose(out_bf, ref_f32, atol=3e-2, rtol=3e-2)

    # --- case 2: general spatial-kernel path (k=3) + multi-tile / masked tail ---
    n2, cin2, h2, w2, cout2, ks2 = 2, 4, 16, 16, 8, 3
    x2 = jax.random.normal(k5, (n2, cin2, h2, w2), dtype=jnp.float32)
    bound2 = 1.0 / ((cin2 * ks2 * ks2) ** 0.5)
    w2gt = jax.random.uniform(k6, (cout2, cin2, ks2, ks2),
                              minval=-bound2, maxval=bound2, dtype=jnp.float32)
    g2 = jnp.ones((cout2,), jnp.float32)
    b2 = jnp.zeros((cout2,), jnp.float32)
    ref2 = jax.block_until_ready(_reference_nchw(x2, w2gt, g2, b2))
    oh2 = h2 - ks2 + 1

    out2 = jax.block_until_ready(
        conv2d_bn_relu(x2, w2gt, g2, b2, matmul_dtype=jnp.float32))
    assert out2.shape == (n2, cout2, oh2, oh2)
    assert jnp.allclose(out2, ref2, atol=1e-4, rtol=1e-4)

    # Small tile -> many tiles: exercises the split ("parallel") stats grid, the
    # clamped duplicate tile of an uneven split, and the masked partial tail.
    out2_small = jax.block_until_ready(
        conv2d_bn_relu(x2, w2gt, g2, b2, matmul_dtype=jnp.float32, tp=16))
    assert jnp.allclose(out2_small, ref2, atol=1e-4, rtol=1e-4)

    print("KERNEL_OK")
</pallas_src>

<mosaic_0001>
module attributes {stable_mosaic.version = 11 : i64} {
  func.func @_conv_stats_kernel(%arg0: i32, %arg1: i32, %arg2: memref<128x36xbf16, #tpu.memory_space<vmem>>, %arg3: memref<36x32xbf16, #tpu.memory_space<vmem>>, %arg4: memref<1x1x32xf32, #tpu.memory_space<vmem>>, %arg5: memref<1x1x32xf32, #tpu.memory_space<vmem>>) attributes {dimension_semantics = [#tpu.dimension_semantics<parallel>, #tpu.dimension_semantics<arbitrary>], iteration_bounds = array<i64: 1, 1>, scalar_prefetch = 0 : i64, scratch_operands = 0 : i64, tpu.core_type = #tpu.core_type<tc>, window_params = [{transform_indices = @transform_0, window_bounds = array<i64: 128, 36>}, {pipeline_mode = #tpu.pipeline_mode<synchronous>, transform_indices = @transform_1, window_bounds = array<i64: 36, 32>}, {transform_indices = @transform_2, window_bounds = array<i64: 1, 1, 32>}, {transform_indices = @transform_3, window_bounds = array<i64: 1, 1, 32>}]} {
    %c0 = arith.constant 0 : index
    %c0_0 = arith.constant 0 : index
    %0 = vector.load %arg2[%c0, %c0_0] : memref<128x36xbf16, #tpu.memory_space<vmem>>, vector<128x36xbf16>
    %c0_1 = arith.constant 0 : index
    %c0_2 = arith.constant 0 : index
    %1 = vector.load %arg3[%c0_1, %c0_2] : memref<36x32xbf16, #tpu.memory_space<vmem>>, vector<36x32xbf16>
    %cst = arith.constant dense<0.000000e+00> : vector<128x32xf32>
    %2 = tpu.matmul %0, %1, %cst {dimension_numbers = #tpu.dot_dimension_numbers<[1], [0], [0], [1], [0, 0, 1, 1], [], []>} : vector<128x36xbf16>, vector<36x32xbf16>, vector<128x32xf32> -> vector<128x32xf32>
    %c1_i32 = arith.constant 1 : i32
    %3 = arith.muli %arg0, %c1_i32 : i32
    %4 = arith.addi %3, %arg1 : i32
    %c128_i32 = arith.constant 128 : i32
    %5 = arith.muli %4, %c128_i32 : i32
    %6 = tpu.iota {dimensions = array<i32: 0>} : vector<128x32xi32>
    %7 = vector.broadcast %5 : i32 to vector<128x32xi32>
    %8 = arith.addi %7, %6 : vector<128x32xi32>
    %c128_i32_3 = arith.constant 128 : i32
    %9 = vector.broadcast %c128_i32_3 : i32 to vector<128x32xi32>
    %10 = arith.cmpi slt, %8, %9 : vector<128x32xi32>
    %cst_4 = arith.constant 0.000000e+00 : f32
    %11 = vector.broadcast %cst_4 : f32 to vector<128x32xf32>
    %12 = arith.select %10, %2, %11 : vector<128x32xi1>, vector<128x32xf32>
    %c0_i32 = arith.constant 0 : i32
    %13 = arith.cmpi eq, %arg1, %c0_i32 : i32
    %14 = arith.extui %13 : i1 to i32
    %c0_i32_5 = arith.constant 0 : i32
    %15 = arith.cmpi ne, %14, %c0_i32_5 : i32
    scf.if %15 {
      %cst_20 = arith.constant 0.000000e+00 : f32
      %29 = vector.broadcast %cst_20 : f32 to vector<1x1x32xf32>
      %c0_21 = arith.constant 0 : index
      %c0_22 = arith.constant 0 : index
      %c0_23 = arith.constant 0 : index
      %30 = vector.load %arg4[%c0_21, %c0_22, %c0_23] : memref<1x1x32xf32, #tpu.memory_space<vmem>>, vector<1x1x32xf32>
      tpu.vector_store %arg4[%c0_21, %c0_22, %c0_23], %29 {strides = array<i32>} : memref<1x1x32xf32, #tpu.memory_space<vmem>>, vector<1x1x32xf32>,
      %cst_24 = arith.constant 0.000000e+00 : f32
      %31 = vector.broadcast %cst_24 : f32 to vector<1x1x32xf32>
      %c0_25 = arith.constant 0 : index
      %c0_26 = arith.constant 0 : index
      %c0_27 = arith.constant 0 : index
      %32 = vector.load %arg5[%c0_25, %c0_26, %c0_27] : memref<1x1x32xf32, #tpu.memory_space<vmem>>, vector<1x1x32xf32>
      tpu.vector_store %arg5[%c0_25, %c0_26, %c0_27], %31 {strides = array<i32>} : memref<1x1x32xf32, #tpu.memory_space<vmem>>, vector<1x1x32xf32>,
    } else {
    }
    %c0_6 = arith.constant 0 : index
    %c0_7 = arith.constant 0 : index
    %c0_8 = arith.constant 0 : index
    %16 = vector.load %arg4[%c0_6, %c0_7, %c0_8] : memref<1x1x32xf32, #tpu.memory_space<vmem>>, vector<1x1x32xf32>
    %cst_9 = arith.constant dense<0.000000e+00> : vector<32xf32>
    %17 = vector.multi_reduction <add>, %12, %cst_9 [0] : vector<128x32xf32> to vector<32xf32>
    %18 = vector.shape_cast %17 : vector<32xf32> to vector<1x32xf32>
    %19 = vector.shape_cast %18 : vector<1x32xf32> to vector<1x1x32xf32>
    %20 = arith.addf %16, %19 : vector<1x1x32xf32>
    %c0_10 = arith.constant 0 : index
    %c0_11 = arith.constant 0 : index
    %c0_12 = arith.constant 0 : index
    %21 = vector.load %arg4[%c0_10, %c0_11, %c0_12] : memref<1x1x32xf32, #tpu.memory_space<vmem>>, vector<1x1x32xf32>
    tpu.vector_store %arg4[%c0_10, %c0_11, %c0_12], %20 {strides = array<i32>} : memref<1x1x32xf32, #tpu.memory_space<vmem>>, vector<1x1x32xf32>,
    %c0_13 = arith.constant 0 : index
    %c0_14 = arith.constant 0 : index
    %c0_15 = arith.constant 0 : index
    %22 = vector.load %arg5[%c0_13, %c0_14, %c0_15] : memref<1x1x32xf32, #tpu.memory_space<vmem>>, vector<1x1x32xf32>
    %23 = arith.mulf %12, %12 : vector<128x32xf32>
    %cst_16 = arith.constant dense<0.000000e+00> : vector<32xf32>
    %24 = vector.multi_reduction <add>, %23, %cst_16 [0] : vector<128x32xf32> to vector<32xf32>
    %25 = vector.shape_cast %24 : vector<32xf32> to vector<1x32xf32>
    %26 = vector.shape_cast %25 : vector<1x32xf32> to vector<1x1x32xf32>
    %27 = arith.addf %22, %26 : vector<1x1x32xf32>
    %c0_17 = arith.constant 0 : index
    %c0_18 = arith.constant 0 : index
    %c0_19 = arith.constant 0 : index
    %28 = vector.load %arg5[%c0_17, %c0_18, %c0_19] : memref<1x1x32xf32, #tpu.memory_space<vmem>>, vector<1x1x32xf32>
    tpu.vector_store %arg5[%c0_17, %c0_18, %c0_19], %27 {strides = array<i32>} : memref<1x1x32xf32, #tpu.memory_space<vmem>>, vector<1x1x32xf32>,
    return
  }
  func.func @transform_0(%arg0: i32, %arg1: i32) -> (i32, i32) {
    %c1_i32 = arith.constant 1 : i32
    %0 = arith.muli %arg0, %c1_i32 : i32
    %1 = arith.addi %0, %arg1 : i32
    %c0_i32 = arith.constant 0 : i32
    %2 = arith.minsi %1, %c0_i32 : i32
    %c0_i32_0 = arith.constant 0 : i32
    %c0_i32_1 = arith.constant 0 : i32
    return %2, %c0_i32_0 : i32, i32
  }
  func.func @transform_1(%arg0: i32, %arg1: i32) -> (i32, i32) {
    %c0_i32 = arith.constant 0 : i32
    %c0_i32_0 = arith.constant 0 : i32
    %c0_i32_1 = arith.constant 0 : i32
    return %c0_i32, %c0_i32_0 : i32, i32
  }
  func.func @transform_2(%arg0: i32, %arg1: i32) -> (i32, i32, i32) {
    %c0_i32 = arith.constant 0 : i32
    %c0_i32_0 = arith.constant 0 : i32
    %c0_i32_1 = arith.constant 0 : i32
    return %arg0, %c0_i32, %c0_i32_0 : i32, i32, i32
  }
  func.func @transform_3(%arg0: i32, %arg1: i32) -> (i32, i32, i32) {
    %c0_i32 = arith.constant 0 : i32
    %c0_i32_0 = arith.constant 0 : i32
    %c0_i32_1 = arith.constant 0 : i32
    return %arg0, %c0_i32, %c0_i32_0 : i32, i32, i32
  }
}

module attributes {stable_mosaic.version = 11 : i64} {
  func.func @_conv_bn_relu_kernel(%arg0: i32, %arg1: memref<128x36xbf16, #tpu.memory_space<vmem>>, %arg2: memref<36x32xbf16, #tpu.memory_space<vmem>>, %arg3: memref<1x32xf32, #tpu.memory_space<vmem>>, %arg4: memref<1x32xf32, #tpu.memory_space<vmem>>, %arg5: memref<128x32xf32, #tpu.memory_space<vmem>>) attributes {dimension_semantics = [#tpu.dimension_semantics<parallel>], iteration_bounds = array<i64: 1>, scalar_prefetch = 0 : i64, scratch_operands = 0 : i64, tpu.core_type = #tpu.core_type<tc>, window_params = [{transform_indices = @transform_0, window_bounds = array<i64: 128, 36>}, {pipeline_mode = #tpu.pipeline_mode<synchronous>, transform_indices = @transform_1, window_bounds = array<i64: 36, 32>}, {pipeline_mode = #tpu.pipeline_mode<synchronous>, transform_indices = @transform_2, window_bounds = array<i64: 1, 32>}, {pipeline_mode = #tpu.pipeline_mode<synchronous>, transform_indices = @transform_3, window_bounds = array<i64: 1, 32>}, {transform_indices = @transform_4, window_bounds = array<i64: 128, 32>}]} {
    %c0 = arith.constant 0 : index
    %c0_0 = arith.constant 0 : index
    %0 = vector.load %arg1[%c0, %c0_0] : memref<128x36xbf16, #tpu.memory_space<vmem>>, vector<128x36xbf16>
    %c0_1 = arith.constant 0 : index
    %c0_2 = arith.constant 0 : index
    %1 = vector.load %arg2[%c0_1, %c0_2] : memref<36x32xbf16, #tpu.memory_space<vmem>>, vector<36x32xbf16>
    %cst = arith.constant dense<0.000000e+00> : vector<128x32xf32>
    %2 = tpu.matmul %0, %1, %cst {dimension_numbers = #tpu.dot_dimension_numbers<[1], [0], [0], [1], [0, 0, 1, 1], [], []>} : vector<128x36xbf16>, vector<36x32xbf16>, vector<128x32xf32> -> vector<128x32xf32>
    %c0_3 = arith.constant 0 : index
    %c0_4 = arith.constant 0 : index
    %3 = vector.load %arg3[%c0_3, %c0_4] : memref<1x32xf32, #tpu.memory_space<vmem>>, vector<1x32xf32>
    %4 = vector.broadcast %3 : vector<1x32xf32> to vector<128x32xf32>
    %5 = arith.mulf %2, %4 : vector<128x32xf32>
    %c0_5 = arith.constant 0 : index
    %c0_6 = arith.constant 0 : index
    %6 = vector.load %arg4[%c0_5, %c0_6] : memref<1x32xf32, #tpu.memory_space<vmem>>, vector<1x32xf32>
    %7 = vector.broadcast %6 : vector<1x32xf32> to vector<128x32xf32>
    %8 = arith.addf %5, %7 : vector<128x32xf32>
    %cst_7 = arith.constant 0.000000e+00 : f32
    %9 = vector.broadcast %cst_7 : f32 to vector<128x32xf32>
    %10 = arith.maximumf %8, %9 : vector<128x32xf32>
    %c0_8 = arith.constant 0 : index
    %c0_9 = arith.constant 0 : index
    %11 = vector.load %arg5[%c0_8, %c0_9] : memref<128x32xf32, #tpu.memory_space<vmem>>, vector<128x32xf32>
    tpu.vector_store %arg5[%c0_8, %c0_9], %10 {strides = array<i32>} : memref<128x32xf32, #tpu.memory_space<vmem>>, vector<128x32xf32>,
    return
  }
  func.func @transform_0(%arg0: i32) -> (i32, i32) {
    %c0_i32 = arith.constant 0 : i32
    %c0_i32_0 = arith.constant 0 : i32
    return %arg0, %c0_i32 : i32, i32
  }
  func.func @transform_1(%arg0: i32) -> (i32, i32) {
    %c0_i32 = arith.constant 0 : i32
    %c0_i32_0 = arith.constant 0 : i32
    %c0_i32_1 = arith.constant 0 : i32
    return %c0_i32, %c0_i32_0 : i32, i32
  }
  func.func @transform_2(%arg0: i32) -> (i32, i32) {
    %c0_i32 = arith.constant 0 : i32
    %c0_i32_0 = arith.constant 0 : i32
    %c0_i32_1 = arith.constant 0 : i32
    return %c0_i32, %c0_i32_0 : i32, i32
  }
  func.func @transform_3(%arg0: i32) -> (i32, i32) {
    %c0_i32 = arith.constant 0 : i32
    %c0_i32_0 = arith.constant 0 : i32
    %c0_i32_1 = arith.constant 0 : i32
    return %c0_i32, %c0_i32_0 : i32, i32
  }
  func.func @transform_4(%arg0: i32) -> (i32, i32) {
    %c0_i32 = arith.constant 0 : i32
    %c0_i32_0 = arith.constant 0 : i32
    return %arg0, %c0_i32 : i32, i32
  }
}

</mosaic_0001>

<bundles_post_ra>
// kernel: conv2d_bn_relu_nhwc.2
= control target key start
LH: loop header
LB: loop body
LE: loop exit
PB: predicated region body
PF: predicated region fallthrough
CT: control target
= control target key end

     0   :  { %vm147_vm0 = vcmask 1041408   ;;  %vm122_vm1 = vcmask 293888   ;;  %vm276_vm2 = vcmask 261120   ;;  %vm272_vm3 = vcmask 253952   ;;  %s576_s1 = inlined_call_operand.vmem [shape: bf16[36,32], index: 1, kind: input, shape index: {}]   ;;  %s577_s0 = inlined_call_operand.vmem [shape: bf16[128,36], index: 0, kind: input, shape index: {}]   ;;  %s578_s2 = inlined_call_operand.vmem [shape: f32[1,1,32], index: 2, kind: output, shape index: {0}]   ;;  %s579_s3 = inlined_call_operand.vmem [shape: f32[1,1,32], index: 3, kind: output, shape index: {1}]  }
   0x1   :  { %v66_v0 = vld [vmem:[%s576_s1 + $0x10] sm:$0x3]  ;;  %v444_v4 = vld [vmem:[%s576_s1 + $0x8] sm:$0xff]  ;;  %v443_v5 = vld [vmem:[%s576_s1] sm:$0xff]  ;;  %v455_v27 = vmov 0.0  }
   0x2   :  { %v116_v1 = vunpack.c.l.b16 %v66_v0  ;;  %v435_v6 = vld [vmem:[%s577_s0] sm:$0xff]  ;;  %v437_v7 = vld [vmem:[%s577_s0 + $0x10] sm:$0xff]  ;;  %v436_v10 = vld [vmem:[%s577_s0 + $0x8] sm:$0xff]  ;;  %273 = vst.msk [vmem:[%s578_s2] sm:$0x1] %vm272_vm3, %v455_v27 }
   0x3   :  { %v439_v8 = vld [vmem:[%s577_s0 + $0x20] sm:$0xff]  ;;  %v441_v9 = vld [vmem:[%s577_s0 + $0x30] sm:$0xff]  ;;  %v438_v11 = vld [vmem:[%s577_s0 + $0x18] sm:$0xff]  ;;  %274 = vst.msk [vmem:[%s579_s3] sm:$0x1] %vm272_vm3, %v455_v27 }
   0x4   :  { %v119_v2 = vpack.c.b16 %v116_v1, %v116_v1  ;;  %v440_v12 = vld [vmem:[%s577_s0 + $0x28] sm:$0xff]  ;;  %v442_v13 = vld [vmem:[%s577_s0 + $0x38] sm:$0xff] }
   0x6   :  { %v149_v3 = vsel %vm147_vm0, %v119_v2, 0 }
   0x7   :  { %156 = vmatpush.bf16.msra.mxu0 %v149_v3  ;;  %445 = vmatpush.bf16.msra.mxu1 %v149_v3 }
   0x8   :  { %446 = vmatpush.bf16.msra.mxu2 %v149_v3  ;;  %447 = vmatpush.bf16.msra.mxu3 %v149_v3 }
   0xb   :  { %157 = vmatpush.bf16.msra.mxu0 %v444_v4  ;;  %448 = vmatpush.bf16.msra.mxu1 %v444_v4 }
   0xc   :  { %449 = vmatpush.bf16.msra.mxu2 %v444_v4  ;;  %450 = vmatpush.bf16.msra.mxu3 %v444_v4 }
   0xf   :  { %158 = vmatpush.bf16.msra.mxu0 %v443_v5  ;;  %451 = vmatpush.bf16.msra.mxu1 %v443_v5 }
  0x10   :  { %452 = vmatpush.bf16.msra.mxu2 %v443_v5  ;;  %453 = vmatpush.bf16.msra.mxu3 %v443_v5 }
  0x12   :  { %427 = vmatmul.msk.bf16.vlgmr.msra.gmra.mxu0 %vm122_vm1, %v435_v6  ;;  %429 = vmatmul.msk.bf16.vlgmr.msra.gmra.mxu1 %vm122_vm1, %v437_v7 }
  0x13   :  { %431 = vmatmul.msk.bf16.vlgmr.msra.gmra.mxu2 %vm122_vm1, %v439_v8  ;;  %433 = vmatmul.msk.bf16.vlgmr.msra.gmra.mxu3 %vm122_vm1, %v441_v9 }
  0x22   :  { %428 = vmatmul.msk.bf16.gmra.mxu0 %vm122_vm1, %v436_v10  ;;  %430 = vmatmul.msk.bf16.gmra.mxu1 %vm122_vm1, %v438_v11 }
  0x23   :  { %432 = vmatmul.msk.bf16.gmra.mxu2 %vm122_vm1, %v440_v12  ;;  %434 = vmatmul.msk.bf16.gmra.mxu3 %vm122_vm1, %v442_v13 }
  0x8f   :  { %v160_v14 = vpop.f32.mrf.mxu0  ;;  %v170_v15 = vpop.f32.mrf.mxu1 }
  0x90   :  { %v318_v24 = vmul.f32 %v160_v14, %v160_v14  ;;  %v277_v28 = vsel %vm276_vm2, %v160_v14, 0.0  ;;  %v322_v38 = vmul.f32 %v170_v15, %v170_v15  ;;  %v284_v44 = vsel %vm276_vm2, %v170_v15, 0.0 }
  0x92   :  { %v334_v32 = vsel %vm276_vm2, %v318_v24, 0.0  ;;  %v341_v50 = vsel %vm276_vm2, %v322_v38, 0.0 }
  0x96   :  { %v180_v16 = vpop.f32.mrf.mxu2  ;;  %v517_v19 = vpop.f32.mrf.mxu3 }
  0x97   :  { %v162_v17 = vpop.f32.mrf.mxu0  ;;  %v172_v18 = vpop.f32.mrf.mxu1  ;;  %v326_v60 = vmul.f32 %v180_v16, %v180_v16  ;;  %v292_v2 = vsel %vm276_vm2, %v180_v16, 0.0 }
  0x98   :  { %v319_v22 = vmul.f32 %v162_v17, %v162_v17  ;;  %v278_v25 = vsel %vm276_vm2, %v162_v17, 0.0  ;;  %v323_v45 = vmul.f32 %v172_v18, %v172_v18  ;;  %v286_v51 = vsel %vm276_vm2, %v172_v18, 0.0 }
  0x99   :  { %v279_v31 = vadd.f32 %v278_v25, %v277_v28  ;;  %v349_v8 = vsel %vm276_vm2, %v326_v60, 0.0  ;;  %v330_v18 = vmul.f32 %v517_v19, %v517_v19 }
  0x9a   :  { %v335_v29 = vsel %vm276_vm2, %v319_v22, 0.0  ;;  %v343_v55 = vsel %vm276_vm2, %v323_v45, 0.0 }
  0x9b   :  { %v336_v34 = vadd.f32 %v335_v29, %v334_v32 }
  0x9e   :  { %v182_v21 = vpop.f32.mrf.mxu2  ;;  %v192_v37 = vpop.f32.mrf.mxu3 }
  0x9f   :  { %v165_v20 = vpop.f32.mrf.mxu0  ;;  %v175_v23 = vpop.f32.mrf.mxu1  ;;  %v327_v3 = vmul.f32 %v182_v21, %v182_v21  ;;  %v294_v9 = vsel %vm276_vm2, %v182_v21, 0.0  ;;  %v300_v21 = vsel %vm276_vm2, %v517_v19, 0.0  ;;  %v331_v25 = vmul.f32 %v192_v37, %v192_v37 }
  0xa0   :  { %v320_v26 = vmul.f32 %v165_v20, %v165_v20  ;;  %v280_v30 = vsel %vm276_vm2, %v165_v20, 0.0  ;;  %v324_v52 = vmul.f32 %v175_v23, %v175_v23  ;;  %v288_v56 = vsel %vm276_vm2, %v175_v23, 0.0 }
  0xa1   :  { %v281_v35 = vadd.f32 %v280_v30, %v279_v31  ;;  %v351_v13 = vsel %vm276_vm2, %v327_v3, 0.0  ;;  %v357_v30 = vsel %vm276_vm2, %v330_v18, 0.0  ;;  %v302_v31 = vsel %vm276_vm2, %v192_v37, 0.0 }
  0xa2   :  { %v337_v33 = vsel %vm276_vm2, %v320_v26, 0.0  ;;  %v345_v61 = vsel %vm276_vm2, %v324_v52, 0.0 }
  0xa3   :  { %v338_v41 = vadd.f32 %v337_v33, %v336_v34 }
  0xa6   :  { %v185_v43 = vpop.f32.mrf.mxu2  ;;  %v195_v1 = vpop.f32.mrf.mxu3 }
  0xa7   :  { %v167_v36 = vpop.f32.mrf.mxu0  ;;  %v177_v49 = vpop.f32.mrf.mxu1  ;;  %v328_v10 = vmul.f32 %v185_v43, %v185_v43  ;;  %v296_v14 = vsel %vm276_vm2, %v185_v43, 0.0  ;;  %v332_v32 = vmul.f32 %v195_v1, %v195_v1 }
  0xa8   :  { %v282_v39 = vsel %vm276_vm2, %v167_v36, 0.0  ;;  %v321_v40 = vmul.f32 %v167_v36, %v167_v36  ;;  %v325_v57 = vmul.f32 %v177_v49, %v177_v49  ;;  %v290_v62 = vsel %vm276_vm2, %v177_v49, 0.0 }
  0xa9   :  { %v283_v42 = vadd.f32 %v282_v39, %v281_v35  ;;  %v353_v20 = vsel %vm276_vm2, %v328_v10, 0.0  ;;  %v359_v35 = vsel %vm276_vm2, %v331_v25, 0.0  ;;  %v304_v36 = vsel %vm276_vm2, %v195_v1, 0.0 }
  0xaa   :  { %v339_v46 = vsel %vm276_vm2, %v321_v40, 0.0  ;;  %v347_v4 = vsel %vm276_vm2, %v325_v57, 0.0  ;;  %v361_v40 = vsel %vm276_vm2, %v332_v32, 0.0  ;;  %v317_v57 = vld [vmem:[%s579_s3] sm:$0x1] }
  0xab   :  { %v285_v47 = vadd.f32 %v284_v44, %v283_v42  ;;  %v340_v48 = vadd.f32 %v339_v46, %v338_v41 }
  0xad   :  { %v342_v53 = vadd.f32 %v341_v50, %v340_v48  ;;  %v287_v54 = vadd.f32 %v286_v51, %v285_v47 }
  0xae   :  { %v187_v7 = vpop.f32.mrf.mxu2  ;;  %v197_v29 = vpop.f32.mrf.mxu3 }
  0xaf   :  { %v289_v58 = vadd.f32 %v288_v56, %v287_v54  ;;  %v344_v59 = vadd.f32 %v343_v55, %v342_v53  ;;  %v329_v15 = vmul.f32 %v187_v7, %v187_v7  ;;  %v298_v22 = vsel %vm276_vm2, %v187_v7, 0.0  ;;  %v275_v54 = vld [vmem:[%s578_s2] sm:$0x1] }
  0xb0   :  { %v333_v38 = vmul.f32 %v197_v29, %v197_v29  ;;  %v306_v41 = vsel %vm276_vm2, %v197_v29, 0.0 }
  0xb1   :  { %v291_v63 = vadd.f32 %v290_v62, %v289_v58  ;;  %v346_v0 = vadd.f32 %v345_v61, %v344_v59  ;;  %v355_v26 = vsel %vm276_vm2, %v329_v15, 0.0 }
  0xb2   :  { %v363_v44 = vsel %vm276_vm2, %v333_v38, 0.0 }
  0xb3   :  { %v293_v5 = vadd.f32 %v292_v2, %v291_v63  ;;  %v348_v6 = vadd.f32 %v347_v4, %v346_v0 }
  0xb5   :  { %v350_v11 = vadd.f32 %v349_v8, %v348_v6  ;;  %v295_v12 = vadd.f32 %v294_v9, %v293_v5 }
  0xb7   :  { %v297_v17 = vadd.f32 %v296_v14, %v295_v12  ;;  %v352_v16 = vadd.f32 %v351_v13, %v350_v11 }
  0xb9   :  { %v354_v23 = vadd.f32 %v353_v20, %v352_v16  ;;  %v299_v24 = vadd.f32 %v298_v22, %v297_v17 }
  0xbb   :  { %v301_v27 = vadd.f32 %v300_v21, %v299_v24  ;;  %v356_v28 = vadd.f32 %v355_v26, %v354_v23 }
  0xbd   :  { %v358_v33 = vadd.f32 %v357_v30, %v356_v28  ;;  %v303_v34 = vadd.f32 %v302_v31, %v301_v27 }
  0xbf   :  { %v305_v39 = vadd.f32 %v304_v36, %v303_v34  ;;  %v360_v19 = vadd.f32 %v359_v35, %v358_v33 }
  0xc1   :  { %v362_v42 = vadd.f32 %v361_v40, %v360_v19  ;;  %v307_v43 = vadd.f32 %v306_v41, %v305_v39 }
  0xc3   :  { %v308_v45 = vrot.slane %v307_v43, 4  ;;  %v364_v37 = vadd.f32 %v363_v44, %v362_v42 }
  0xc5   :  { %v309_v46 = vadd.f32 %v308_v45, %v307_v43  ;;  %v365_v47 = vrot.slane %v364_v37, 4 }
  0xc7   :  { %v310_v48 = vrot.slane %v309_v46, 2  ;;  %v366_v49 = vadd.f32 %v365_v47, %v364_v37 }
  0xc9   :  { %v311_v50 = vadd.f32 %v310_v48, %v309_v46  ;;  %v367_v51 = vrot.slane %v366_v49, 2 }
  0xcb   :  { %v312_v52 = vrot.slane %v311_v50, 1  ;;  %v368_v53 = vadd.f32 %v367_v51, %v366_v49 }
  0xcd   :  { %v313_v55 = vadd.f32 %v312_v52, %v311_v50  ;;  %v369_v56 = vrot.slane %v368_v53, 1 }
  0xcf   :  { %v314_v58 = vadd.f32 %v313_v55, %v275_v54  ;;  %v370_v59 = vadd.f32 %v369_v56, %v368_v53 }
  0xd1   :  { %316 = vst.msk [vmem:[%s578_s2] sm:$0x1] %vm272_vm3, %v314_v58  ;;  %v371_v60 = vadd.f32 %v370_v59, %v317_v57 }
  0xd3   :  { %372 = vst.msk [vmem:[%s579_s3] sm:$0x1] %vm272_vm3, %v371_v60 }

// kernel: conv2d_bn_relu_nhwc.3
= control target key start
LH: loop header
LB: loop body
LE: loop exit
PB: predicated region body
PF: predicated region fallthrough
CT: control target
= control target key end

     0   :  { %vm120_vm0 = vcmask 1041408   ;;  %s492_s0 = inlined_call_operand.vmem [shape: bf16[128,36], index: 0, kind: input, shape index: {}]   ;;  %s493_s1 = inlined_call_operand.vmem [shape: bf16[36,32], index: 1, kind: input, shape index: {}]   ;;  %s494_s2 = inlined_call_operand.vmem [shape: f32[1,32], index: 2, kind: input, shape index: {}]   ;;  %s495_s3 = inlined_call_operand.vmem [shape: f32[1,32], index: 3, kind: input, shape index: {}]   ;;  %s496_s4 = inlined_call_operand.hbm [shape: f32[128,32], index: 4, kind: output, shape index: {}]  }
   0x1   :  { %v39_v0 = vld [vmem:[%s493_s1 + $0x10] sm:$0x3] }
   0x2   :  { %v89_v1 = vunpack.c.l.b16 %v39_v0 }
   0x4   :  { %v92_v2 = vpack.c.b16 %v89_v1, %v89_v1 }
   0x5   :  { %9 = vsyncpa [#allocation3], 0  ;;  %v321_v4 = vld [vmem:[%s493_s1 + $0x8] sm:$0xff]  ;;  %v320_v5 = vld [vmem:[%s493_s1] sm:$0xff]  ;;  %vm95_vm1 = vcmask 293888   ;;  %vm229_vm2 = vcmask 261120  }
   0x6   :  { %v122_v3 = vsel %vm120_vm0, %v92_v2, 0  ;;  %v312_v6 = vld [vmem:[%s492_s0] sm:$0xff]  ;;  %v314_v7 = vld [vmem:[%s492_s0 + $0x10] sm:$0xff]  ;;  %v313_v10 = vld [vmem:[%s492_s0 + $0x8] sm:$0xff]  ;;  %s252_s15 = sshll.u32 %s496_s4, 4  ;;  %s363_s16 = smov 128   ;;  %s253_s15 = int_to_ptr.hbm [resolvable:$true] %s252_s15 }
   0x7   :  { %129 = vmatpush.bf16.msra.mxu0 %v122_v3  ;;  %322 = vmatpush.bf16.msra.mxu1 %v122_v3  ;;  %v316_v8 = vld [vmem:[%s492_s0 + $0x20] sm:$0xff]  ;;  %v318_v9 = vld [vmem:[%s492_s0 + $0x30] sm:$0xff]  ;;  %v315_v11 = vld [vmem:[%s492_s0 + $0x18] sm:$0xff]  ;;  %s364_s17 = smov 8  }
   0x8   :  { %323 = vmatpush.bf16.msra.mxu2 %v122_v3  ;;  %324 = vmatpush.bf16.msra.mxu3 %v122_v3  ;;  %v317_v12 = vld [vmem:[%s492_s0 + $0x28] sm:$0xff]  ;;  %v319_v13 = vld [vmem:[%s492_s0 + $0x38] sm:$0xff]  ;;  %v434_v14 = vld [vmem:[%s494_s2] ss:$0 sm:$0xff]  ;;  %s362_s0 = smov [#allocation2]  }
   0x9   :  { %v439_v15 = vld [vmem:[%s495_s3] ss:$0 sm:$0xff]  ;;  %s250_s2 = sshll.u32 %s362_s0, 4  ;;  %s251_s2 = int_to_ptr.vmem [resolvable:$true] %s250_s2 }
   0xb   :  { %130 = vmatpush.bf16.msra.mxu0 %v321_v4  ;;  %325 = vmatpush.bf16.msra.mxu1 %v321_v4 }
   0xc   :  { %326 = vmatpush.bf16.msra.mxu2 %v321_v4  ;;  %327 = vmatpush.bf16.msra.mxu3 %v321_v4 }
   0xf   :  { %131 = vmatpush.bf16.msra.mxu0 %v320_v5  ;;  %328 = vmatpush.bf16.msra.mxu1 %v320_v5 }
  0x10   :  { %329 = vmatpush.bf16.msra.mxu2 %v320_v5  ;;  %330 = vmatpush.bf16.msra.mxu3 %v320_v5 }
  0x12   :  { %304 = vmatmul.msk.bf16.vlgmr.msra.gmra.mxu0 %vm95_vm1, %v312_v6  ;;  %306 = vmatmul.msk.bf16.vlgmr.msra.gmra.mxu1 %vm95_vm1, %v314_v7 }
  0x13   :  { %308 = vmatmul.msk.bf16.vlgmr.msra.gmra.mxu2 %vm95_vm1, %v316_v8  ;;  %310 = vmatmul.msk.bf16.vlgmr.msra.gmra.mxu3 %vm95_vm1, %v318_v9 }
  0x22   :  { %305 = vmatmul.msk.bf16.gmra.mxu0 %vm95_vm1, %v313_v10  ;;  %307 = vmatmul.msk.bf16.gmra.mxu1 %vm95_vm1, %v315_v11 }
  0x23   :  { %309 = vmatmul.msk.bf16.gmra.mxu2 %vm95_vm1, %v317_v12  ;;  %311 = vmatmul.msk.bf16.gmra.mxu3 %vm95_vm1, %v319_v13 }
  0x8f   :  { %v133_v16 = vpop.f32.mrf.mxu0  ;;  %v143_v17 = vpop.f32.mrf.mxu1 }
  0x90   :  { %v177_v18 = vmul.f32 %v434_v14, %v133_v16  ;;  %v181_v19 = vmul.f32 %v434_v14, %v143_v17 }
  0x92   :  { %v197_v20 = vadd.f32 %v439_v15, %v177_v18  ;;  %v201_v21 = vadd.f32 %v439_v15, %v181_v19 }
  0x94   :  { %v213_v22 = vmax.f32 %v197_v20, 0.0  ;;  %v217_v23 = vmax.f32 %v201_v21, 0.0 }
  0x96   :  { %230 = vst.msk [vmem:[#allocation2] sm:$0xff] %vm229_vm2, %v213_v22  ;;  %v153_v24 = vpop.f32.mrf.mxu2  ;;  %v163_v25 = vpop.f32.mrf.mxu3 }
  0x97   :  { %234 = vst.msk [vmem:[#allocation2 + $0x20] sm:$0xff] %vm229_vm2, %v217_v23  ;;  %v185_v26 = vmul.f32 %v434_v14, %v153_v24  ;;  %v189_v27 = vmul.f32 %v434_v14, %v163_v25  ;;  %v135_v28 = vpop.f32.mrf.mxu0  ;;  %v145_v29 = vpop.f32.mrf.mxu1 }
  0x98   :  { %v178_v30 = vmul.f32 %v434_v14, %v135_v28  ;;  %v182_v31 = vmul.f32 %v434_v14, %v145_v29 }
  0x99   :  { %v205_v32 = vadd.f32 %v439_v15, %v185_v26  ;;  %v209_v33 = vadd.f32 %v439_v15, %v189_v27 }
  0x9a   :  { %v198_v34 = vadd.f32 %v439_v15, %v178_v30  ;;  %v202_v35 = vadd.f32 %v439_v15, %v182_v31 }
  0x9b   :  { %v221_v36 = vmax.f32 %v205_v32, 0.0  ;;  %v225_v37 = vmax.f32 %v209_v33, 0.0 }
  0x9c   :  { %v214_v38 = vmax.f32 %v198_v34, 0.0  ;;  %v218_v39 = vmax.f32 %v202_v35, 0.0 }
  0x9d   :  { %238 = vst.msk [vmem:[#allocation2 + $0x40] sm:$0xff] %vm229_vm2, %v221_v36 }
  0x9e   :  { %242 = vst.msk [vmem:[#allocation2 + $0x60] sm:$0xff] %vm229_vm2, %v225_v37  ;;  %v155_v40 = vpop.f32.mrf.mxu2  ;;  %v165_v41 = vpop.f32.mrf.mxu3 }
  0x9f   :  { %231 = vst.msk [vmem:[#allocation2 + $0x8] sm:$0xff] %vm229_vm2, %v214_v38  ;;  %v186_v42 = vmul.f32 %v434_v14, %v155_v40  ;;  %v190_v43 = vmul.f32 %v434_v14, %v165_v41  ;;  %v138_v44 = vpop.f32.mrf.mxu0  ;;  %v148_v45 = vpop.f32.mrf.mxu1 }
  0xa0   :  { %235 = vst.msk [vmem:[#allocation2 + $0x28] sm:$0xff] %vm229_vm2, %v218_v39  ;;  %v179_v46 = vmul.f32 %v434_v14, %v138_v44  ;;  %v183_v47 = vmul.f32 %v434_v14, %v148_v45 }
  0xa1   :  { %v206_v48 = vadd.f32 %v439_v15, %v186_v42  ;;  %v210_v49 = vadd.f32 %v439_v15, %v190_v43 }
  0xa2   :  { %v199_v50 = vadd.f32 %v439_v15, %v179_v46  ;;  %v203_v51 = vadd.f32 %v439_v15, %v183_v47 }
  0xa3   :  { %v222_v52 = vmax.f32 %v206_v48, 0.0  ;;  %v226_v53 = vmax.f32 %v210_v49, 0.0 }
  0xa4   :  { %v215_v54 = vmax.f32 %v199_v50, 0.0  ;;  %v219_v55 = vmax.f32 %v203_v51, 0.0 }
  0xa5   :  { %239 = vst.msk [vmem:[#allocation2 + $0x48] sm:$0xff] %vm229_vm2, %v222_v52 }
  0xa6   :  { %243 = vst.msk [vmem:[#allocation2 + $0x68] sm:$0xff] %vm229_vm2, %v226_v53  ;;  %v158_v56 = vpop.f32.mrf.mxu2  ;;  %v168_v57 = vpop.f32.mrf.mxu3 }
  0xa7   :  { %232 = vst.msk [vmem:[#allocation2 + $0x10] sm:$0xff] %vm229_vm2, %v215_v54  ;;  %v187_v58 = vmul.f32 %v434_v14, %v158_v56  ;;  %v191_v59 = vmul.f32 %v434_v14, %v168_v57  ;;  %v140_v60 = vpop.f32.mrf.mxu0  ;;  %v150_v61 = vpop.f32.mrf.mxu1 }
  0xa8   :  { %236 = vst.msk [vmem:[#allocation2 + $0x30] sm:$0xff] %vm229_vm2, %v219_v55  ;;  %v180_v62 = vmul.f32 %v434_v14, %v140_v60  ;;  %v184_v63 = vmul.f32 %v434_v14, %v150_v61 }
  0xa9   :  { %v207_v0 = vadd.f32 %v439_v15, %v187_v58  ;;  %v211_v1 = vadd.f32 %v439_v15, %v191_v59 }
  0xaa   :  { %v200_v2 = vadd.f32 %v439_v15, %v180_v62  ;;  %v204_v3 = vadd.f32 %v439_v15, %v184_v63 }
  0xab   :  { %v223_v4 = vmax.f32 %v207_v0, 0.0  ;;  %v227_v5 = vmax.f32 %v211_v1, 0.0 }
  0xac   :  { %v216_v6 = vmax.f32 %v200_v2, 0.0  ;;  %v220_v7 = vmax.f32 %v204_v3, 0.0 }
  0xad   :  { %240 = vst.msk [vmem:[#allocation2 + $0x50] sm:$0xff] %vm229_vm2, %v223_v4 }
  0xae   :  { %244 = vst.msk [vmem:[#allocation2 + $0x70] sm:$0xff] %vm229_vm2, %v227_v5  ;;  %v160_v8 = vpop.f32.mrf.mxu2  ;;  %v170_v9 = vpop.f32.mrf.mxu3 }
  0xaf   :  { %233 = vst.msk [vmem:[#allocation2 + $0x18] sm:$0xff] %vm229_vm2, %v216_v6  ;;  %v188_v10 = vmul.f32 %v434_v14, %v160_v8  ;;  %v192_v11 = vmul.f32 %v434_v14, %v170_v9 }
  0xb0   :  { %237 = vst.msk [vmem:[#allocation2 + $0x38] sm:$0xff] %vm229_vm2, %v220_v7 }
  0xb1   :  { %v208_v12 = vadd.f32 %v439_v15, %v188_v10  ;;  %v212_v13 = vadd.f32 %v439_v15, %v192_v11 }
  0xb3   :  { %v224_v16 = vmax.f32 %v208_v12, 0.0  ;;  %v228_v17 = vmax.f32 %v212_v13, 0.0 }
  0xb5   :  { %241 = vst.msk [vmem:[#allocation2 + $0x58] sm:$0xff] %vm229_vm2, %v224_v16 }
  0xb6   :  { %245 = vst.msk [vmem:[#allocation2 + $0x78] sm:$0xff] %vm229_vm2, %v228_v17 }
  0xb7   :  { %258 = dma.vmem_to_hbm [thread:$0]  %s251_s2, 2048, %s253_s15, [#allocation3], %s363_s16, %s363_s16, %s364_s17  }
  0xb8   :  { %360 = dma.done.wait [#allocation3], 2048  }
  0xb9   :  { %361 = vsyncadd [#allocation3], 4294965248 }
  0xba   :  { %263 = vsyncpa [#allocation3], 1 }

</bundles_post_ra>
